<compile_context>
chip_gen: v5e
topology: v5e:2x2
jax: 0.10.0
libtpu: 0.0.40
codegen_flags: <defaults>
</compile_context>

<pallas_src>
import functools

import numpy as np
import jax
import jax.numpy as jnp
from jax.experimental import pallas as pl
from jax.experimental.pallas import tpu as pltpu


# ----------------------------- config ------------------------------------- #
BATCH = 2
LATENT = 32
UNFLAT_IMG = (4, 4)              # (Hu, Wu)
CNN_CHANNELS = [8, 4]            # conv-transpose channels: 8 -> 4 -> 1
CNN_KERNELS = [3, 3]             # spatial: 4 -> 6 -> 8  (stride 1, pad 0)
OUT_H, OUT_W = 16, 16
UNFLAT_SLOPE = 0.01
CNN_SLOPE = 0.01
OUT_SLOPE = 0.01
DTYPE = jnp.float32

# LeakyReLU slope per fused affine stage:
#   unflatten linear, conv-transpose 1, conv-transpose 2, Linear2D (output)
STAGE_SLOPES = (UNFLAT_SLOPE,) + (CNN_SLOPE,) * len(CNN_KERNELS) + (OUT_SLOPE,)


def _leaky(x, slope):
    return jnp.where(x >= 0, x, slope * x)


# -------------------- fused decoder kernel (no grid) ----------------------- #
def _decoder_kernel(*refs, slopes):
    # refs = (x_ref, w_ref0, b_ref0, w_ref1, b_ref1, ..., o_ref)
    # Every stage is:  y = leaky(y @ W + b, slope)   (batch lives in M).
    x_ref = refs[0]
    o_ref = refs[-1]
    y = x_ref[...]
    for i, slope in enumerate(slopes):
        w_ref = refs[1 + 2 * i]
        b_ref = refs[2 + 2 * i]
        y = jnp.dot(y, w_ref[...], preferred_element_type=jnp.float32)
        y = _leaky(y + b_ref[...], slope)
    o_ref[...] = y.astype(o_ref.dtype)


def fused_decoder(latent, layers, slopes, out_hw):
    """latent: (B, L); layers: sequence of (W: (Din, Dout), b: (1, Dout))."""
    B = latent.shape[0]
    n_out = layers[-1][0].shape[1]
    flat_args = [latent]
    for w, b in layers:
        flat_args.append(w)
        flat_args.append(b)
    vmem = pl.BlockSpec(memory_space=pltpu.MemorySpace.VMEM)
    out_flat = pl.pallas_call(
        functools.partial(_decoder_kernel, slopes=tuple(slopes)),
        out_shape=jax.ShapeDtypeStruct((B, n_out), latent.dtype),
        in_specs=[vmem] * len(flat_args),
        out_specs=vmem,
    )(*flat_args)
    return out_flat.reshape(B, *out_hw)


# -------------------- host-side dense-weight construction ------------------ #
def convt_dense_matrix(w, H, W):
    """ConvTranspose2d (stride=1, pad=0) as a dense matrix.

    w: (kH, kW, Cin, Cout).  Maps a CHW-flattened input (Cin, H, W) to a
    CHW-flattened output (Cout, Ho, Wo) with Ho=H+kH-1, Wo=W+kW-1.
    """
    w = np.asarray(w)
    kH, kW, Cin, Cout = w.shape
    Ho, Wo = H + kH - 1, W + kW - 1
    M = np.zeros((Cin * H * W, Cout * Ho * Wo), np.float32)
    for ci in range(Cin):
        for h in range(H):
            for wp in range(W):
                row = (ci * H + h) * W + wp
                for kh in range(kH):
                    for kw in range(kW):
                        col_sp = (h + kh) * Wo + (wp + kw)
                        for co in range(Cout):
                            M[row, co * Ho * Wo + col_sp] += w[kh, kw, ci, co]
    return M


def convt_dense_bias(b, Ho, Wo):
    """b: (1, Cout) -> (1, Cout*Ho*Wo) in CHW flat order."""
    b = np.asarray(b).reshape(-1)
    return np.repeat(b[:, None], Ho * Wo, axis=1).reshape(1, -1).astype(np.float32)


def linear2d_dense(ww, bw, wh, bh):
    """Fold Linear2D (width linear then height linear) into one affine map.

    out[ho, wo] = sum_{hd,wd} wh[ho,hd] * x[hd,wd] * ww[wd,wo]
                  + (sum_hd wh[ho,hd]) * bw[wo] + bh[ho]
    """
    ww, bw, wh, bh = map(np.asarray, (ww, bw, wh, bh))
    Hd = wh.shape[1]
    Wd, Wout = ww.shape
    Hout = wh.shape[0]
    M = np.einsum("oh,wx->hwox", wh, ww).reshape(Hd * Wd, Hout * Wout)
    bias = (wh.sum(axis=1, keepdims=True) * bw + bh).reshape(1, Hout * Wout)
    return M.astype(np.float32), bias.astype(np.float32)


def prepare_params(raw):
    """Build the fused per-stage (W, b) list consumed by the Pallas kernel."""
    Hu, Wu = UNFLAT_IMG
    layers = [(raw["lin_w"], raw["lin_b"])]          # unflatten linear (CHW order)
    H, W = Hu, Wu
    for w, b in raw["convs"]:
        kH, kW, _, _ = w.shape
        Ho, Wo = H + kH - 1, W + kW - 1
        layers.append((jnp.asarray(convt_dense_matrix(w, H, W)),
                       jnp.asarray(convt_dense_bias(b, Ho, Wo))))
        H, W = Ho, Wo
    M, bias = linear2d_dense(raw["ww"], raw["bw"], raw["wh"], raw["bh"])
    layers.append((jnp.asarray(M), jnp.asarray(bias)))
    return {"layers": tuple(layers)}


# ------------------------------ parameters --------------------------------- #
def init_raw_params(key):
    Hu, Wu = UNFLAT_IMG
    C0 = CNN_CHANNELS[0]
    params = {}
    keys = jax.random.split(key, 16)
    ki = iter(keys)

    def unif(k, shape, fan_in):
        bound = 1.0 / jnp.sqrt(float(fan_in))
        return jax.random.uniform(k, shape, DTYPE, -bound, bound)

    # unflatten: single Linear(latent -> C0*Hu*Wu); weight stored as (Din, Dout),
    # output columns in PyTorch Unflatten (C, H, W) flat order.
    dout = C0 * Hu * Wu
    params["lin_w"] = unif(next(ki), (LATENT, dout), LATENT)
    params["lin_b"] = unif(next(ki), (1, dout), LATENT)

    # DCNN conv-transpose layers: channels [C0] + CNN_CHANNELS[1:] + [1]
    chans = [C0] + CNN_CHANNELS[1:] + [1]
    convs = []
    for layer, k in enumerate(CNN_KERNELS):
        cin, cout = chans[layer], chans[layer + 1]
        fan_in = cin * k * k
        w = unif(next(ki), (k, k, cin, cout), fan_in)   # (kH, kW, Cin, Cout)
        b = unif(next(ki), (1, cout), fan_in)
        convs.append((w, b))
    params["convs"] = convs

    # Linear2D: width linear (Wd -> OUT_W), height linear (Hd -> OUT_H)
    Hd = Hu + sum(k - 1 for k in CNN_KERNELS)
    Wd = Wu + sum(k - 1 for k in CNN_KERNELS)
    params["ww"] = unif(next(ki), (Wd, OUT_W), Wd)       # x @ ww
    params["bw"] = unif(next(ki), (1, OUT_W), Wd)
    params["wh"] = unif(next(ki), (OUT_H, Hd), Hd)       # wh @ x
    params["bh"] = unif(next(ki), (OUT_H, 1), Hd)
    return params


# ------------------------------ forward ------------------------------------ #
@jax.jit
def cnn_jet_img_decoder_forward(latent, prepared):
    return fused_decoder(latent, prepared["layers"], STAGE_SLOPES, (OUT_H, OUT_W))


# ---------------------------- pure-JAX reference ---------------------------- #
def reference_forward(latent, raw):
    """Per-tap conv-transpose scatter reference on raw (unfused) params."""
    Hu, Wu = UNFLAT_IMG
    C0 = CNN_CHANNELS[0]
    B = latent.shape[0]
    y = _leaky(latent @ raw["lin_w"] + raw["lin_b"], UNFLAT_SLOPE)
    y = y.reshape(B, C0, Hu, Wu).transpose(0, 2, 3, 1)          # NHWC
    for w, b in raw["convs"]:
        kH, kW, _, Cout = w.shape
        _, H, W, _ = y.shape
        out = jnp.zeros((B, H + kH - 1, W + kW - 1, Cout), jnp.float32)
        for kh in range(kH):
            for kw in range(kW):
                yk = jnp.einsum("bhwc,cd->bhwd", y, w[kh, kw])
                out = out.at[:, kh:kh + H, kw:kw + W, :].add(yk)
        y = _leaky(out + b[0], CNN_SLOPE).astype(DTYPE)
    x = y[..., 0]                                                # (B, Hd, Wd)
    x = x @ raw["ww"] + raw["bw"]                                # width linear
    x = jnp.einsum("oh,bhw->bow", raw["wh"], x) + raw["bh"]      # height linear
    return _leaky(x, OUT_SLOPE).astype(DTYPE)


# --------------------------------- main ------------------------------------ #
if __name__ == "__main__":
    key = jax.random.PRNGKey(0)
    k_param, k_in = jax.random.split(key)
    raw_params = init_raw_params(k_param)
    prepared_params = prepare_params(raw_params)
    latent_vec = jax.random.normal(k_in, (BATCH, LATENT), DTYPE)

    out = cnn_jet_img_decoder_forward(latent_vec, prepared_params)
    out = jax.block_until_ready(out)

    ref = reference_forward(latent_vec, raw_params)
    assert out.shape == (BATCH, OUT_H, OUT_W), out.shape
    assert jnp.allclose(out, ref, atol=1e-4, rtol=1e-4), \
        float(jnp.max(jnp.abs(out - ref)))

    print("KERNEL_OK")
</pallas_src>

<mosaic_0001>
module attributes {stable_mosaic.version = 11 : i64} {
  func.func @_decoder_kernel(%arg0: memref<2x32xf32, #tpu.memory_space<vmem>>, %arg1: memref<32x128xf32, #tpu.memory_space<vmem>>, %arg2: memref<1x128xf32, #tpu.memory_space<vmem>>, %arg3: memref<128x144xf32, #tpu.memory_space<vmem>>, %arg4: memref<1x144xf32, #tpu.memory_space<vmem>>, %arg5: memref<144x64xf32, #tpu.memory_space<vmem>>, %arg6: memref<1x64xf32, #tpu.memory_space<vmem>>, %arg7: memref<64x256xf32, #tpu.memory_space<vmem>>, %arg8: memref<1x256xf32, #tpu.memory_space<vmem>>, %arg9: memref<2x256xf32, #tpu.memory_space<vmem>>) attributes {dimension_semantics = [], scalar_prefetch = 0 : i64, scratch_operands = 0 : i64, tpu.core_type = #tpu.core_type<tc>} {
    %c0 = arith.constant 0 : index
    %c0_0 = arith.constant 0 : index
    %0 = vector.load %arg0[%c0, %c0_0] : memref<2x32xf32, #tpu.memory_space<vmem>>, vector<2x32xf32>
    %c0_1 = arith.constant 0 : index
    %c0_2 = arith.constant 0 : index
    %1 = vector.load %arg1[%c0_1, %c0_2] : memref<32x128xf32, #tpu.memory_space<vmem>>, vector<32x128xf32>
    %cst = arith.constant dense<0.000000e+00> : vector<2x128xf32>
    %2 = tpu.matmul %0, %1, %cst {dimension_numbers = #tpu.dot_dimension_numbers<[1], [0], [0], [1], [0, 0, 1, 1], [], []>} : vector<2x32xf32>, vector<32x128xf32>, vector<2x128xf32> -> vector<2x128xf32>
    %c0_3 = arith.constant 0 : index
    %c0_4 = arith.constant 0 : index
    %3 = vector.load %arg2[%c0_3, %c0_4] : memref<1x128xf32, #tpu.memory_space<vmem>>, vector<1x128xf32>
    %4 = vector.broadcast %3 : vector<1x128xf32> to vector<2x128xf32>
    %5 = arith.addf %2, %4 : vector<2x128xf32>
    %cst_5 = arith.constant 0.000000e+00 : f32
    %6 = vector.broadcast %cst_5 : f32 to vector<2x128xf32>
    %7 = arith.cmpf oge, %5, %6 : vector<2x128xf32>
    %cst_6 = arith.constant 0.00999999977 : f32
    %8 = vector.broadcast %cst_6 : f32 to vector<2x128xf32>
    %9 = arith.mulf %8, %5 : vector<2x128xf32>
    %10 = arith.select %7, %5, %9 : vector<2x128xi1>, vector<2x128xf32>
    %c0_7 = arith.constant 0 : index
    %c0_8 = arith.constant 0 : index
    %11 = vector.load %arg3[%c0_7, %c0_8] : memref<128x144xf32, #tpu.memory_space<vmem>>, vector<128x144xf32>
    %cst_9 = arith.constant dense<0.000000e+00> : vector<2x144xf32>
    %12 = tpu.matmul %10, %11, %cst_9 {dimension_numbers = #tpu.dot_dimension_numbers<[1], [0], [0], [1], [0, 0, 1, 1], [], []>} : vector<2x128xf32>, vector<128x144xf32>, vector<2x144xf32> -> vector<2x144xf32>
    %c0_10 = arith.constant 0 : index
    %c0_11 = arith.constant 0 : index
    %13 = vector.load %arg4[%c0_10, %c0_11] : memref<1x144xf32, #tpu.memory_space<vmem>>, vector<1x144xf32>
    %14 = vector.broadcast %13 : vector<1x144xf32> to vector<2x144xf32>
    %15 = arith.addf %12, %14 : vector<2x144xf32>
    %cst_12 = arith.constant 0.000000e+00 : f32
    %16 = vector.broadcast %cst_12 : f32 to vector<2x144xf32>
    %17 = arith.cmpf oge, %15, %16 : vector<2x144xf32>
    %cst_13 = arith.constant 0.00999999977 : f32
    %18 = vector.broadcast %cst_13 : f32 to vector<2x144xf32>
    %19 = arith.mulf %18, %15 : vector<2x144xf32>
    %20 = arith.select %17, %15, %19 : vector<2x144xi1>, vector<2x144xf32>
    %c0_14 = arith.constant 0 : index
    %c0_15 = arith.constant 0 : index
    %21 = vector.load %arg5[%c0_14, %c0_15] : memref<144x64xf32, #tpu.memory_space<vmem>>, vector<144x64xf32>
    %cst_16 = arith.constant dense<0.000000e+00> : vector<2x64xf32>
    %22 = tpu.matmul %20, %21, %cst_16 {dimension_numbers = #tpu.dot_dimension_numbers<[1], [0], [0], [1], [0, 0, 1, 1], [], []>} : vector<2x144xf32>, vector<144x64xf32>, vector<2x64xf32> -> vector<2x64xf32>
    %c0_17 = arith.constant 0 : index
    %c0_18 = arith.constant 0 : index
    %23 = vector.load %arg6[%c0_17, %c0_18] : memref<1x64xf32, #tpu.memory_space<vmem>>, vector<1x64xf32>
    %24 = vector.broadcast %23 : vector<1x64xf32> to vector<2x64xf32>
    %25 = arith.addf %22, %24 : vector<2x64xf32>
    %cst_19 = arith.constant 0.000000e+00 : f32
    %26 = vector.broadcast %cst_19 : f32 to vector<2x64xf32>
    %27 = arith.cmpf oge, %25, %26 : vector<2x64xf32>
    %cst_20 = arith.constant 0.00999999977 : f32
    %28 = vector.broadcast %cst_20 : f32 to vector<2x64xf32>
    %29 = arith.mulf %28, %25 : vector<2x64xf32>
    %30 = arith.select %27, %25, %29 : vector<2x64xi1>, vector<2x64xf32>
    %c0_21 = arith.constant 0 : index
    %c0_22 = arith.constant 0 : index
    %31 = vector.load %arg7[%c0_21, %c0_22] : memref<64x256xf32, #tpu.memory_space<vmem>>, vector<64x256xf32>
    %cst_23 = arith.constant dense<0.000000e+00> : vector<2x256xf32>
    %32 = tpu.matmul %30, %31, %cst_23 {dimension_numbers = #tpu.dot_dimension_numbers<[1], [0], [0], [1], [0, 0, 1, 1], [], []>} : vector<2x64xf32>, vector<64x256xf32>, vector<2x256xf32> -> vector<2x256xf32>
    %c0_24 = arith.constant 0 : index
    %c0_25 = arith.constant 0 : index
    %33 = vector.load %arg8[%c0_24, %c0_25] : memref<1x256xf32, #tpu.memory_space<vmem>>, vector<1x256xf32>
    %34 = vector.broadcast %33 : vector<1x256xf32> to vector<2x256xf32>
    %35 = arith.addf %32, %34 : vector<2x256xf32>
    %cst_26 = arith.constant 0.000000e+00 : f32
    %36 = vector.broadcast %cst_26 : f32 to vector<2x256xf32>
    %37 = arith.cmpf oge, %35, %36 : vector<2x256xf32>
    %cst_27 = arith.constant 0.00999999977 : f32
    %38 = vector.broadcast %cst_27 : f32 to vector<2x256xf32>
    %39 = arith.mulf %38, %35 : vector<2x256xf32>
    %40 = arith.select %37, %35, %39 : vector<2x256xi1>, vector<2x256xf32>
    %c0_28 = arith.constant 0 : index
    %c0_29 = arith.constant 0 : index
    %41 = vector.load %arg9[%c0_28, %c0_29] : memref<2x256xf32, #tpu.memory_space<vmem>>, vector<2x256xf32>
    tpu.vector_store %arg9[%c0_28, %c0_29], %40 {strides = array<i32>} : memref<2x256xf32, #tpu.memory_space<vmem>>, vector<2x256xf32>,
    return
  }
}

</mosaic_0001>

<bundles_post_ra>
// kernel: cnn_jet_img_decoder_forward.1
= control target key start
LH: loop header
LB: loop body
LE: loop exit
PB: predicated region body
PF: predicated region fallthrough
CT: control target
= control target key end

     0   :  { %vm41_vm0 = vcmask 261120   ;;  %vm174_vm4 = vcmask 130048   ;;  %vm243_vm6 = vcmask 523264   ;;  %vm296_vm9 = vcmask 1041408   ;;  %s588_s1 = inlined_call_operand.vmem [shape: f32[32,128], index: 1, kind: input, shape index: {}]   ;;  %s589_s3 = inlined_call_operand.vmem [shape: f32[128,144], index: 3, kind: input, shape index: {}]   ;;  %s590_s0 = inlined_call_operand.vmem [shape: f32[2,32], index: 0, kind: input, shape index: {}]   ;;  %s591_s2 = inlined_call_operand.vmem [shape: f32[1,128], index: 2, kind: input, shape index: {}]   ;;  %s592_s5 = inlined_call_operand.vmem [shape: f32[144,64], index: 5, kind: input, shape index: {}]   ;;  %s593_s6 = inlined_call_operand.vmem [shape: f32[1,64], index: 6, kind: input, shape index: {}]   ;;  %s594_s7 = inlined_call_operand.vmem [shape: f32[64,256], index: 7, kind: input, shape index: {}]   ;;  %s595_s4 = inlined_call_operand.vmem [shape: f32[1,144], index: 4, kind: input, shape index: {}]   ;;  %s596_s8 = inlined_call_operand.vmem [shape: f32[1,256], index: 8, kind: input, shape index: {}]   ;;  %s597_s9 = inlined_call_operand.vmem [shape: f32[2,256], index: 9, kind: output, shape index: {}]  }
   0x1   :  { %v36_v0 = vld [vmem:[%s588_s1 + $0x18] sm:$0xff]  ;;  %v35_v1 = vld [vmem:[%s588_s1 + $0x10] sm:$0xff]  ;;  %v34_v2 = vld [vmem:[%s588_s1 + $0x8] sm:$0xff] }
   0x2   :  { %57 = vmatpush.msra.mxu1 %v36_v0  ;;  %v99_v3 = vld [vmem:[%s589_s3 + $0xf8] sm:$0xff]  ;;  %v97_v4 = vld [vmem:[%s589_s3 + $0xe8] sm:$0xff]  ;;  %v33_v5 = vld [vmem:[%s588_s1] sm:$0xff] }
   0x3   :  { %126 = vmatpush.msra.mxu2 %v99_v3  ;;  %v95_v6 = vld [vmem:[%s589_s3 + $0xd8] sm:$0xff]  ;;  %v32_v7 = vld [vmem:[%s590_s0] sm:$0x3]  ;;  %v98_v8 = vld [vmem:[%s589_s3 + $0xf0] sm:$0xff] }
   0x4   :  { %58 = vmatpush.msra.mxu1 %v35_v1  ;;  %v93_v9 = vld [vmem:[%s589_s3 + $0xc8] sm:$0xff]  ;;  %v96_v10 = vld [vmem:[%s589_s3 + $0xe0] sm:$0xff]  ;;  %v91_v11 = vld [vmem:[%s589_s3 + $0xb8] sm:$0xff] }
   0x5   :  { %127 = vmatpush.msra.mxu2 %v97_v4  ;;  %v94_v12 = vld [vmem:[%s589_s3 + $0xd0] sm:$0xff]  ;;  %v89_v13 = vld [vmem:[%s589_s3 + $0xa8] sm:$0xff]  ;;  %v92_v14 = vld [vmem:[%s589_s3 + $0xc0] sm:$0xff] }
   0x6   :  { %59 = vmatpush.msra.mxu1 %v34_v2  ;;  %v87_v15 = vld [vmem:[%s589_s3 + $0x98] sm:$0xff]  ;;  %v90_v16 = vld [vmem:[%s589_s3 + $0xb0] sm:$0xff]  ;;  %v85_v17 = vld [vmem:[%s589_s3 + $0x88] sm:$0xff] }
   0x7   :  { %128 = vmatpush.msra.mxu2 %v95_v6  ;;  %v88_v18 = vld [vmem:[%s589_s3 + $0xa0] sm:$0xff]  ;;  %v83_v19 = vld [vmem:[%s589_s3 + $0x78] sm:$0xff]  ;;  %v86_v20 = vld [vmem:[%s589_s3 + $0x90] sm:$0xff] }
   0x8   :  { %60 = vmatpush.msra.mxu1 %v33_v5  ;;  %v81_v21 = vld [vmem:[%s589_s3 + $0x68] sm:$0xff]  ;;  %v84_v22 = vld [vmem:[%s589_s3 + $0x80] sm:$0xff]  ;;  %v79_v23 = vld [vmem:[%s589_s3 + $0x58] sm:$0xff] }
   0x9   :  { %304 = vmatmul.msk.f32.vlgmr.msra.gmra.mxu1 %vm41_vm0, %v32_v7  ;;  %129 = vmatpush.msra.mxu2 %v93_v9  ;;  %v82_v24 = vld [vmem:[%s589_s3 + $0x70] sm:$0xff]  ;;  %v77_v25 = vld [vmem:[%s589_s3 + $0x48] sm:$0xff]  ;;  %v80_v26 = vld [vmem:[%s589_s3 + $0x60] sm:$0xff] }
   0xa   :  { %106 = vmatpush.msrb.mxu1 %v98_v8  ;;  %v75_v27 = vld [vmem:[%s589_s3 + $0x38] sm:$0xff]  ;;  %v78_v28 = vld [vmem:[%s589_s3 + $0x50] sm:$0xff]  ;;  %v76_v29 = vld [vmem:[%s589_s3 + $0x40] sm:$0xff] }
   0xb   :  { %130 = vmatpush.msra.mxu2 %v91_v11  ;;  %v74_v30 = vld [vmem:[%s589_s3 + $0x30] sm:$0xff]  ;;  %v72_v31 = vld [vmem:[%s589_s3 + $0x20] sm:$0xff]  ;;  %v73_v32 = vld [vmem:[%s589_s3 + $0x28] sm:$0xff] }
   0xc   :  { %107 = vmatpush.msrb.mxu1 %v96_v10  ;;  %v70_v33 = vld [vmem:[%s589_s3 + $0x10] sm:$0xff]  ;;  %v71_v34 = vld [vmem:[%s589_s3 + $0x18] sm:$0xff]  ;;  %v68_v35 = vld [vmem:[%s589_s3] sm:$0xff] }
   0xd   :  { %131 = vmatpush.msra.mxu2 %v89_v13  ;;  %v69_v36 = vld [vmem:[%s589_s3 + $0x8] sm:$0xff]  ;;  %v167_v37 = vld [vmem:[%s592_s5 + $0x78] sm:$0xff]  ;;  %v166_v38 = vld [vmem:[%s592_s5 + $0x70] sm:$0xff] }
   0xe   :  { %108 = vmatpush.msrb.mxu1 %v94_v12  ;;  %178 = vmatpush.msra.mxu3 %v167_v37  ;;  %v165_v39 = vld [vmem:[%s592_s5 + $0x68] sm:$0xff]  ;;  %v164_v40 = vld [vmem:[%s592_s5 + $0x60] sm:$0xff]  ;;  %v163_v41 = vld [vmem:[%s592_s5 + $0x58] sm:$0xff] }
   0xf   :  { %132 = vmatpush.msra.mxu2 %v87_v15  ;;  %v162_v42 = vld [vmem:[%s592_s5 + $0x50] sm:$0xff]  ;;  %v161_v43 = vld [vmem:[%s592_s5 + $0x48] sm:$0xff]  ;;  %v160_v44 = vld [vmem:[%s592_s5 + $0x40] sm:$0xff] }
  0x10   :  { %109 = vmatpush.msrb.mxu1 %v92_v14  ;;  %179 = vmatpush.msra.mxu3 %v166_v38  ;;  %v159_v45 = vld [vmem:[%s592_s5 + $0x38] sm:$0xff]  ;;  %v158_v46 = vld [vmem:[%s592_s5 + $0x30] sm:$0xff]  ;;  %v157_v47 = vld [vmem:[%s592_s5 + $0x28] sm:$0xff] }
  0x11   :  { %133 = vmatpush.msra.mxu2 %v85_v17  ;;  %v156_v48 = vld [vmem:[%s592_s5 + $0x20] sm:$0xff]  ;;  %v155_v49 = vld [vmem:[%s592_s5 + $0x18] sm:$0xff]  ;;  %v154_v55 = vld [vmem:[%s592_s5 + $0x10] sm:$0xff] }
  0x12   :  { %110 = vmatpush.msrb.mxu1 %v90_v16  ;;  %180 = vmatpush.msra.mxu3 %v165_v39  ;;  %v308_v50 = vld [vmem:[%s591_s2] ss:$0 sm:$0xff]  ;;  %v153_v56 = vld [vmem:[%s592_s5 + $0x8] sm:$0xff]  ;;  %v235_v60 = vld [vmem:[%s594_s7 + $0x70] sm:$0xff] }
  0x13   :  { %134 = vmatpush.msra.mxu2 %v83_v19  ;;  %v152_v57 = vld [vmem:[%s592_s5] sm:$0xff]  ;;  %v169_v58 = vld [vmem:[%s592_s5 + $0x88] sm:$0xff]  ;;  %v231_v62 = vld [vmem:[%s594_s7 + $0x50] sm:$0xff] }
  0x14   :  { %111 = vmatpush.msrb.mxu1 %v88_v18  ;;  %181 = vmatpush.msra.mxu3 %v164_v40  ;;  %v168_v59 = vld [vmem:[%s592_s5 + $0x80] sm:$0xff]  ;;  %v227_v0 = vld [vmem:[%s594_s7 + $0x30] sm:$0xff]  ;;  %v236_v15 = vld [vmem:[%s594_s7 + $0x78] sm:$0xff] }
  0x15   :  { %135 = vmatpush.msra.mxu2 %v81_v21  ;;  %212 = vmatpush.msra.mxu0 %v169_v58  ;;  %v233_v61 = vld [vmem:[%s594_s7 + $0x60] sm:$0xff]  ;;  %v223_v2 = vld [vmem:[%s594_s7 + $0x10] sm:$0xff]  ;;  %v234_v16 = vld [vmem:[%s594_s7 + $0x68] sm:$0xff] }
  0x16   :  { %112 = vmatpush.msrb.mxu1 %v86_v20  ;;  %182 = vmatpush.msra.mxu3 %v163_v41  ;;  %v229_v63 = vld [vmem:[%s594_s7 + $0x40] sm:$0xff]  ;;  %v232_v17 = vld [vmem:[%s594_s7 + $0x58] sm:$0xff]  ;;  %v230_v18 = vld [vmem:[%s594_s7 + $0x48] sm:$0xff] }
  0x17   :  { %136 = vmatpush.msra.mxu2 %v79_v23  ;;  %213 = vmatpush.msra.mxu0 %v168_v59  ;;  %v225_v1 = vld [vmem:[%s594_s7 + $0x20] sm:$0xff]  ;;  %v228_v19 = vld [vmem:[%s594_s7 + $0x38] sm:$0xff]  ;;  %v226_v20 = vld [vmem:[%s594_s7 + $0x28] sm:$0xff] }
  0x18   :  { %113 = vmatpush.msrb.mxu1 %v84_v22  ;;  %183 = vmatpush.msra.mxu3 %v162_v42  ;;  %v100_v3 = vld [vmem:[%s595_s4] sm:$0x3]  ;;  %v224_v21 = vld [vmem:[%s594_s7 + $0x18] sm:$0xff]  ;;  %v222_v22 = vld [vmem:[%s594_s7 + $0x8] sm:$0xff] }
  0x19   :  { %137 = vmatpush.msra.mxu2 %v77_v25  ;;  %255 = vmatpush.msrb.mxu0 %v235_v60  ;;  %v102_v4 = vperm.slane %v100_v3, 0  ;;  %v103_v7 = vperm.slane %v100_v3, 1  ;;  %v221_v14 = vld [vmem:[%s594_s7] sm:$0xff] }
  0x1a   :  { %114 = vmatpush.msrb.mxu1 %v82_v24  ;;  %184 = vmatpush.msra.mxu3 %v161_v43  ;;  %v309_v23 = vld [vmem:[%s593_s6] ss:$0 sm:$0xff] }
  0x1b   :  { %138 = vmatpush.msra.mxu2 %v75_v27  ;;  %256 = vmatpush.msrb.mxu0 %v233_v61 }
  0x1c   :  { %115 = vmatpush.msrb.mxu1 %v80_v26  ;;  %185 = vmatpush.msra.mxu3 %v160_v44 }
  0x1d   :  { %139 = vmatpush.msra.mxu2 %v73_v32  ;;  %257 = vmatpush.msrb.mxu0 %v231_v62 }
  0x1e   :  { %116 = vmatpush.msrb.mxu1 %v78_v28  ;;  %186 = vmatpush.msra.mxu3 %v159_v45 }
  0x1f   :  { %140 = vmatpush.msra.mxu2 %v71_v34  ;;  %258 = vmatpush.msrb.mxu0 %v229_v63 }
  0x20   :  { %117 = vmatpush.msrb.mxu1 %v76_v29  ;;  %187 = vmatpush.msra.mxu3 %v158_v46 }
  0x21   :  { %141 = vmatpush.msra.mxu2 %v69_v36  ;;  %259 = vmatpush.msrb.mxu0 %v227_v0 }
  0x22   :  { %118 = vmatpush.msrb.mxu1 %v74_v30  ;;  %188 = vmatpush.msra.mxu3 %v157_v47  ;;  %v237_v30 = vld [vmem:[%s596_s8] sm:$0x3] }
  0x23   :  { %260 = vmatpush.msrb.mxu0 %v225_v1  ;;  %v239_v32 = vperm.slane %v237_v30, 0 }
  0x24   :  { %119 = vmatpush.msrb.mxu1 %v72_v31  ;;  %189 = vmatpush.msra.mxu3 %v156_v48 }
  0x25   :  { %261 = vmatpush.msrb.mxu0 %v223_v2 }
  0x26   :  { %120 = vmatpush.msrb.mxu1 %v70_v33  ;;  %190 = vmatpush.msra.mxu3 %v155_v49  ;;  %v240_v33 = vperm.slane %v237_v30, 1 }
  0x27   :  { %262 = vmatpush.msrb.mxu0 %v221_v14 }
  0x28   :  { %121 = vmatpush.msrb.mxu1 %v68_v35  ;;  %191 = vmatpush.msra.mxu3 %v154_v55 }
  0x2a   :  { %192 = vmatpush.msra.mxu3 %v153_v56 }
  0x2c   :  { %193 = vmatpush.msra.mxu3 %v152_v57 }
  0x86   :  { %v62_v51 = vpop.f32.mrf.mxu1 }
  0x87   :  { %v63_v52 = vadd.f32 %v308_v50, %v62_v51 }
  0x89   :  { %v66_v53 = vmul.f32 0.01, %v63_v52  ;;  %vm65_vm1 = vcmp.ge.f32.partialorder %v63_v52, 0.0 }
  0x8b   :  { %v67_v54 = vsel %vm65_vm1, %v63_v52, %v66_v53 }
  0x8c   :  { %122 = vmatmul.f32.vlgmr.msrb.gmra.mxu1 %v67_v54  ;;  %142 = vmatmul.f32.vlgmr.msra.gmra.mxu2 %v67_v54 }
 0x109   :  { %v123_v5 = vpop.f32.mrf.mxu1 }
 0x10a   :  { %v124_v6 = vadd.f32 %v123_v5, %v102_v4 }
 0x10c   :  { %vm146_vm2 = vcmp.ge.f32.partialorder %v124_v6, 0.0  ;;  %v148_v8 = vmul.f32 0.01, %v124_v6 }
 0x10e   :  { %v150_v9 = vsel %vm146_vm2, %v124_v6, %v148_v8 }
 0x10f   :  { %v143_v10 = vpop.f32.mrf.mxu2  ;;  %194 = vmatmul.f32.vlgmr.msra.gmra.mxu3 %v150_v9 }
 0x110   :  { %v144_v11 = vadd.f32 %v143_v10, %v103_v7 }
 0x112   :  { %v149_v12 = vmul.f32 0.01, %v144_v11  ;;  %vm147_vm3 = vcmp.ge.f32.partialorder %v144_v11, 0.0 }
 0x114   :  { %v151_v13 = vsel %vm147_vm3, %v144_v11, %v149_v12 }
 0x115   :  { %305 = vmatmul.msk.f32.vlgmr.msra.gmra.mxu0 %vm174_vm4, %v151_v13 }
 0x116   :  { %275 = vmatpush.msra.mxu0 %v236_v15 }
 0x118   :  { %276 = vmatpush.msra.mxu0 %v234_v16 }
 0x11a   :  { %277 = vmatpush.msra.mxu0 %v232_v17 }
 0x11c   :  { %278 = vmatpush.msra.mxu0 %v230_v18 }
 0x11e   :  { %279 = vmatpush.msra.mxu0 %v228_v19 }
 0x120   :  { %280 = vmatpush.msra.mxu0 %v226_v20 }
 0x122   :  { %281 = vmatpush.msra.mxu0 %v224_v21 }
 0x124   :  { %282 = vmatpush.msra.mxu0 %v222_v22 }
 0x192   :  { %v195_v24 = vpop.f32.mrf.mxu3  ;;  %v215_v26 = vpop.f32.mrf.mxu0 }
 0x193   :  { %v196_v25 = vadd.f32 %v309_v23, %v195_v24 }
 0x195   :  { %v216_v27 = vadd.f32 %v215_v26, %v196_v25 }
 0x197   :  { %vm218_vm5 = vcmp.ge.f32.partialorder %v216_v27, 0.0  ;;  %v219_v28 = vmul.f32 0.01, %v216_v27 }
 0x199   :  { %v220_v29 = vsel %vm218_vm5, %v216_v27, %v219_v28 }
 0x19a   :  { %306 = vmatmul.msk.f32.vlgmr.msrb.gmra.mxu0 %vm243_vm6, %v220_v29 }
 0x1a2   :  { %307 = vmatmul.msk.f32.vlgmr.msra.gmra.mxu0 %vm243_vm6, %v220_v29 }
 0x217   :  { %v264_v31 = vpop.f32.mrf.mxu0 }
 0x218   :  { %v265_v34 = vadd.f32 %v264_v31, %v239_v32 }
 0x21a   :  { %v289_v37 = vmul.f32 0.01, %v265_v34  ;;  %vm287_vm8 = vcmp.ge.f32.partialorder %v265_v34, 0.0 }
 0x21c   :  { %v291_v41 = vsel %vm287_vm8, %v265_v34, %v289_v37 }
 0x21f   :  { %v284_v35 = vpop.f32.mrf.mxu0 }
 0x220   :  { %v285_v36 = vadd.f32 %v284_v35, %v240_v33 }
 0x222   :  { %vm288_vm7 = vcmp.ge.f32.partialorder %v285_v36, 0.0  ;;  %v290_v38 = vmul.f32 0.01, %v285_v36 }
 0x224   :  { %v292_v39 = vsel %vm288_vm7, %v285_v36, %v290_v38 }
 0x225   :  { %v295_v40 = vrot.slane %v292_v39, 6 }
 0x227   :  { %v297_v42 = vsel %vm296_vm9, %v291_v41, %v295_v40 }
 0x228   :  { %299 = vst [vmem:[%s597_s9] sm:$0xf] %v297_v42 }

</bundles_post_ra>
